<compile_context>
chip_gen: v7x
topology: tpu7x:2x2x1
jax: 0.10.0
libtpu: 0.0.40
codegen_flags: <defaults>
</compile_context>

<pallas_src>
import jax
import jax.numpy as jnp
from jax import lax
from jax.experimental import pallas as pl
from jax.experimental.pallas import tpu as pltpu


def moe_matmul_kernel(expert_id_ref, state_ref, w_ref, out_ref, acc_ref):
    # state_ref: (T, tk)   current hidden-dim slice of the token block
    # w_ref:     (tn, tk)  selected expert's weight tile (expert dim squeezed)
    # out_ref:   (T, tn)   output tile (resident across the K axis)
    # acc_ref:   (T, tn)   f32 accumulator scratch
    del expert_id_ref  # only consumed by the index_maps (scalar prefetch)
    k = pl.program_id(1)

    @pl.when(k == 0)
    def _init():
        acc_ref[...] = jnp.zeros_like(acc_ref)

    # Contract on the last dim of both operands: t,h x n,h -> t,n.
    # Avoids the explicit `.T` (XLU transpose / relayout) of the weight tile.
    acc_ref[...] += lax.dot_general(
        state_ref[...],
        w_ref[...],
        dimension_numbers=(((1,), (1,)), ((), ())),
        preferred_element_type=jnp.float32,
    )

    @pl.when(k == pl.num_programs(1) - 1)
    def _finalize():
        out_ref[...] = acc_ref[...].astype(out_ref.dtype)


def moe_matmul(state, w, expert_id, *, tn=None, tk=None,
               vmem_budget_bytes=32 * 1024 * 1024):
    """out = state @ w[expert_id].T as a Pallas TPU kernel.

    state:     [T, H]     tokens routed to this expert.  Batch all tokens for
                          one expert into a single call and pad T to a
                          multiple of 16 (bf16) / 8 (f32) so the MXU is fed.
    w:         [E, N, H]  stacked expert weights (nn.Linear convention).
    expert_id: scalar int expert index (scalar-prefetched into SMEM).
    returns:   [T, N]     in state's dtype (f32 accumulation inside).
    """
    T, H = state.shape
    E, N, H2 = w.shape
    assert H == H2, "state / weight hidden dims disagree"

    s_bytes = jnp.dtype(state.dtype).itemsize
    w_bytes = jnp.dtype(w.dtype).itemsize
    o_bytes = s_bytes

    # ---- tile sizing --------------------------------------------------------
    # Weight-streaming bandwidth is the binding resource, so use the biggest
    # tiles the VMEM budget allows.  32 MiB default budget is safe on v7x
    # (64 MiB physical VMEM) as well as v5e/v6e (128 MiB).
    tile_budget = (3 * vmem_budget_bytes) // 4  # headroom for compiler scratch

    if tk is None:
        # Tile the contraction (hidden) axis only when it is large; the K grid
        # axis + f32 accumulator keeps VMEM bounded independent of H.
        if H % 128 == 0:
            kcands = [t for t in range(128, H + 1, 128)
                      if H % t == 0 and t <= 4096]
            tk = max(kcands)
        else:
            tk = H  # full-extent block is always legal

    if tn is None:
        def fits(t):
            vmem = (2 * t * tk * w_bytes      # weight tile (double-buffered)
                    + 2 * T * tk * s_bytes    # state tile (double-buffered)
                    + 2 * T * t * o_bytes     # output tile (double-buffered)
                    + T * t * 4)              # f32 accumulator scratch
            return vmem <= tile_budget

        if N % 128 == 0:
            cands = [t for t in range(128, N + 1, 128) if N % t == 0]
            # Prefer >=2 tiles along N so the "parallel" axis can split across
            # v7x's two TensorCores (irrelevant but harmless on v5e/v6e).
            pref = [t for t in cands if N // t >= 2] or cands
            fitting = [t for t in pref if fits(t)]
            tn = max(fitting) if fitting else min(pref)
        else:
            tn = N  # full-extent block is always legal

    assert N % tn == 0 and H % tk == 0
    num_n, num_k = N // tn, H // tk
    # TODO(synk): for very large per-expert token batches, additionally tile T
    # (third grid axis) instead of keeping the full (T, tk) state block resident.

    expert_id = jnp.asarray(expert_id, dtype=jnp.int32).reshape((1,))

    grid_spec = pltpu.PrefetchScalarGridSpec(
        num_scalar_prefetch=1,              # expert_id -> SMEM, fed to index_maps
        grid=(num_n, num_k),                # (out-feature tiles, hidden tiles)
        in_specs=[
            # state: k-th hidden slice of the (only) token block
            pl.BlockSpec((T, tk), lambda j, k, eid: (0, k)),
            # weight: expert eid[0], j-th out-feature tile, k-th hidden tile.
            # Leading expert dim squeezed -> kernel sees a clean (tn, tk) ref.
            pl.BlockSpec((pl.Squeezed(), tn, tk),
                         lambda j, k, eid: (eid[0], j, k)),
        ],
        out_specs=pl.BlockSpec((T, tn), lambda j, k, eid: (0, j)),
        scratch_shapes=[pltpu.VMEM((T, tn), jnp.float32)],
    )

    cost = pl.CostEstimate(
        flops=2 * T * N * H,
        transcendentals=0,
        bytes_accessed=N * H * w_bytes + T * H * s_bytes + T * N * o_bytes,
    )

    return pl.pallas_call(
        moe_matmul_kernel,
        out_shape=jax.ShapeDtypeStruct((T, N), state.dtype),
        grid_spec=grid_spec,
        compiler_params=pltpu.CompilerParams(
            dimension_semantics=("parallel", "arbitrary"),
            vmem_limit_bytes=vmem_budget_bytes,
        ),
        cost_estimate=cost,
    )(expert_id, state, w)


if __name__ == "__main__":
    key = jax.random.PRNGKey(0)
    k_state, k_w = jax.random.split(key)

    # Small demo shapes.  T padded to 16 (bf16 sublane packing / MXU feeding),
    # H and N multiples of 128 so lane-dense tiles are used.
    T, H, N, E = 16, 256, 512, 4
    expert_id = 2

    state = jax.random.normal(k_state, (T, H), dtype=jnp.float32).astype(jnp.bfloat16)
    # Deterministic "set_weight": synthetic expert weight stack [E, N, H], bf16
    # to halve HBM bytes on this bandwidth-bound kernel.
    w = (jax.random.normal(k_w, (E, N, H), dtype=jnp.float32) * 0.05).astype(jnp.bfloat16)

    out = moe_matmul(state, w, expert_id)
    out = jax.block_until_ready(out)

    # Reference check against plain JAX (f32 reference, bf16-level tolerance).
    ref = jnp.dot(state.astype(jnp.float32), w[expert_id].astype(jnp.float32).T)
    assert out.shape == (T, N)
    assert out.dtype == state.dtype
    max_err = float(jnp.max(jnp.abs(out.astype(jnp.float32) - ref)))
    assert jnp.allclose(out.astype(jnp.float32), ref, atol=5e-2, rtol=5e-2), (
        f"mismatch vs reference (max abs err {max_err})")

    print("KERNEL_OK")
</pallas_src>

<mosaic_0001>
module attributes {stable_mosaic.version = 11 : i64} {
  func.func @moe_matmul_kernel(%arg0: i32, %arg1: i32, %arg2: memref<1xi32, #tpu.memory_space<smem>>, %arg3: memref<16x256xbf16, #tpu.memory_space<vmem>>, %arg4: memref<1x256x256xbf16, #tpu.memory_space<vmem>>, %arg5: memref<16x256xbf16, #tpu.memory_space<vmem>>, %arg6: memref<16x256xf32, #tpu.memory_space<vmem>>) attributes {dimension_semantics = [#tpu.dimension_semantics<parallel>, #tpu.dimension_semantics<arbitrary>], iteration_bounds = array<i64: 2, 1>, scalar_prefetch = 1 : i64, scratch_operands = 1 : i64, tpu.core_type = #tpu.core_type<tc>, window_params = [{transform_indices = @transform_0, window_bounds = array<i64: 16, 256>}, {transform_indices = @transform_1, window_bounds = array<i64: 1, 256, 256>}, {transform_indices = @transform_2, window_bounds = array<i64: 16, 256>}]} {
    %c0_i32 = arith.constant 0 : i32
    %0 = arith.cmpi eq, %arg1, %c0_i32 : i32
    %1 = arith.extui %0 : i1 to i32
    %c0_i32_0 = arith.constant 0 : i32
    %2 = arith.cmpi ne, %1, %c0_i32_0 : i32
    scf.if %2 {
      %cst_11 = arith.constant 0.000000e+00 : f32
      %13 = vector.broadcast %cst_11 : f32 to vector<16x256xf32>
      %c0_12 = arith.constant 0 : index
      %c0_13 = arith.constant 0 : index
      %14 = vector.load %arg6[%c0_12, %c0_13] : memref<16x256xf32, #tpu.memory_space<vmem>>, vector<16x256xf32>
      tpu.vector_store %arg6[%c0_12, %c0_13], %13 {strides = array<i32>} : memref<16x256xf32, #tpu.memory_space<vmem>>, vector<16x256xf32>,
    } else {
    }
    %c0 = arith.constant 0 : index
    %c0_1 = arith.constant 0 : index
    %3 = vector.load %arg6[%c0, %c0_1] : memref<16x256xf32, #tpu.memory_space<vmem>>, vector<16x256xf32>
    %c0_2 = arith.constant 0 : index
    %c0_3 = arith.constant 0 : index
    %4 = vector.load %arg3[%c0_2, %c0_3] : memref<16x256xbf16, #tpu.memory_space<vmem>>, vector<16x256xbf16>
    %c0_4 = arith.constant 0 : index
    %c0_5 = arith.constant 0 : index
    %c0_6 = arith.constant 0 : index
    %5 = vector.load %arg4[%c0_4, %c0_5, %c0_6] : memref<1x256x256xbf16, #tpu.memory_space<vmem>>, vector<1x256x256xbf16>
    %6 = vector.shape_cast %5 : vector<1x256x256xbf16> to vector<256x256xbf16>
    %cst = arith.constant dense<0.000000e+00> : vector<16x256xf32>
    %7 = tpu.matmul %4, %6, %cst {dimension_numbers = #tpu.dot_dimension_numbers<[1], [1], [0], [0], [0, 0, 1, 0], [], []>} : vector<16x256xbf16>, vector<256x256xbf16>, vector<16x256xf32> -> vector<16x256xf32>
    %8 = arith.addf %3, %7 : vector<16x256xf32>
    %c0_7 = arith.constant 0 : index
    %c0_8 = arith.constant 0 : index
    %9 = vector.load %arg6[%c0_7, %c0_8] : memref<16x256xf32, #tpu.memory_space<vmem>>, vector<16x256xf32>
    tpu.vector_store %arg6[%c0_7, %c0_8], %8 {strides = array<i32>} : memref<16x256xf32, #tpu.memory_space<vmem>>, vector<16x256xf32>,
    %c0_i32_9 = arith.constant 0 : i32
    %10 = arith.cmpi eq, %arg1, %c0_i32_9 : i32
    %11 = arith.extui %10 : i1 to i32
    %c0_i32_10 = arith.constant 0 : i32
    %12 = arith.cmpi ne, %11, %c0_i32_10 : i32
    scf.if %12 {
      %c0_11 = arith.constant 0 : index
      %c0_12 = arith.constant 0 : index
      %13 = vector.load %arg6[%c0_11, %c0_12] : memref<16x256xf32, #tpu.memory_space<vmem>>, vector<16x256xf32>
      %14 = arith.truncf %13 : vector<16x256xf32> to vector<16x256xbf16>
      %c0_13 = arith.constant 0 : index
      %c0_14 = arith.constant 0 : index
      %15 = vector.load %arg5[%c0_13, %c0_14] : memref<16x256xbf16, #tpu.memory_space<vmem>>, vector<16x256xbf16>
      tpu.vector_store %arg5[%c0_13, %c0_14], %14 {strides = array<i32>} : memref<16x256xbf16, #tpu.memory_space<vmem>>, vector<16x256xbf16>,
    } else {
    }
    return
  }
  func.func @transform_0(%arg0: i32, %arg1: i32, %arg2: memref<1xi32, #tpu.memory_space<smem>>) -> (i32, i32) {
    %c0_i32 = arith.constant 0 : i32
    %c0_i32_0 = arith.constant 0 : i32
    return %c0_i32, %arg1 : i32, i32
  }
  func.func @transform_1(%arg0: i32, %arg1: i32, %arg2: memref<1xi32, #tpu.memory_space<smem>>) -> (i32, i32, i32) {
    %c0 = arith.constant 0 : index
    %0 = memref.load %arg2[%c0] : memref<1xi32, #tpu.memory_space<smem>>
    %c0_i32 = arith.constant 0 : i32
    return %0, %arg0, %arg1 : i32, i32, i32
  }
  func.func @transform_2(%arg0: i32, %arg1: i32, %arg2: memref<1xi32, #tpu.memory_space<smem>>) -> (i32, i32) {
    %c0_i32 = arith.constant 0 : i32
    %c0_i32_0 = arith.constant 0 : i32
    return %c0_i32, %arg0 : i32, i32
  }
}

</mosaic_0001>

<bundles_post_ra>
// kernel: tpu_custom_call.1
= control target key start
LH: loop header
LB: loop body
LE: loop exit
PB: predicated region body
PF: predicated region fallthrough
CT: control target
= control target key end

     0   :  { %s1312_s0 = inlined_call_operand.<no memory space> [shape: s32[1], index: 0, kind: input, shape index: {}]   ;;  %s1313_s1 = inlined_call_operand.hbm [shape: bf16[16,256], index: 1, kind: input, shape index: {}]   ;;  %s1314_s2 = inlined_call_operand.hbm [shape: bf16[4,512,256], index: 2, kind: input, shape index: {}]   ;;  %s1315_s3 = inlined_call_operand.hbm [shape: bf16[16,512], index: 3, kind: output, shape index: {}]  }
   0x1   :  { %1326 = sst [smem:[#allocation17_spill]] %s1313_s1 }
   0x2   :  { %8 = sst [smem:[#allocation4]] %s1312_s0 }
   0x3   :  { %9 = vsyncpa [#allocation6], 0 }
   0x4   :  { %10 = vsyncpa [#allocation9], 0 }
   0x5   :  { %12 = vsyncpa [#allocation9 + $0x1], 0 }
   0x6   :  { %13 = vsyncpa [#allocation7], 0 }
   0x7   :  { %15 = vsyncpa [#allocation7 + $0x1], 0  ;;  %s1031_s14 = smov 0   ;;  %s1033_s15 = smov 0  }
   0x8   :  { %s1035_s16 = smov 0   ;;  %s1037_s17 = smov 0  }
   0x9   :  { %s1039_s18 = smov 0   ;;  %s1041_s19 = smov 0  }
   0xa   :  { %s1043_s20 = smov 0   ;;  %s1045_s0 = smov 0  }
   0xb   :  { %s1047_s21 = smov 0  }
   0xc LB: > { %1327 = sst [smem:[#allocation14_spill]] %s966_s14  ;;  %s618_s22 = sadd.s32 4294967295, %s998_s21   ;;  %s998_s21 = sphi %s1047_s21, %s21_s21   ;;  %s994_s0 = sphi %s1045_s0, %s1357_s0   ;;  %s990_s20 = sphi %s1043_s20, %s1356_s20   ;;  %s986_s19 = sphi %s1041_s19, %s1355_s19   ;;  %s982_s18 = sphi %s1039_s18, %s1354_s18   ;;  %s978_s17 = sphi %s1037_s17, %s1353_s17   ;;  %s974_s16 = sphi %s1035_s16, %s1352_s16   ;;  %s970_s15 = sphi %s1033_s15, %s1351_s15   ;;  %s966_s14 = sphi %s1031_s14, %s1350_s14  }
   0xd   : > { %s619_s23 = sadd.s32 4294967294, %s998_s21   ;;  %p85_p0 = scmp.ne.s32.totalorder %s982_s18, %s978_s17 }
   0xe   : > { %p1077_p1 = scmp.eq.s32.totalorder %s618_s22, 0  ;;  %p108_p2 = scmp.ne.s32.totalorder %s974_s16, %s970_s15 }
   0xf   : > { %p109_p3 = scmp.eq.s32.totalorder %s618_s22, 1  ;;  %p114_p5 = scmp.ne.s32.totalorder %s970_s15, %s966_s14 }
  0x10   : > { %s1328_s24 = scalar_select %p1077_p1, 1, 0 }
  0x11   : > { %p1085_p4 = por %p1077_p1, %p85_p0  ;;  %p1091_p6 = por %p109_p3, %p108_p2 }
  0x12   : > { %p115_p7 = scmp.eq.s32.totalorder %s619_s23, 1  ;;  %p620_p8 = scmp.ge.s32.totalorder %s998_s21, 1 }
  0x13   : > { %s1329_s25 = scalar_select %p1085_p4, 1, 0 }
  0x14   : > { %s1330_s26 = scalar_select %p1091_p6, 1, 0 }
  0x15   : > { %p122_p9 = scmp.lt.s32.totalorder %s998_s21, 3  ;;  %p1097_p10 = por %p115_p7, %p114_p5 }
  0x16   : > { %s1000_s29 = smov [#allocation5]   ;;  %s1335_s1 = sld [smem:[#allocation17_spill]] }
  0x17   : > { %s1331_s27 = scalar_select %p1097_p10, 1, 0 }
  0x18   : > { %p1101_p11 = pnand %p620_p8, %p122_p9  ;;  %s137_s30 = sshll.u32 %s1000_s29, 4  ;;  %s138_s30 = int_to_ptr.vmem [resolvable:$true] %s137_s30 }
  0x19   : > { %1332 = sst [smem:[#allocation15_spill]] %s1331_s27 }
  0x1a   : > { %s1333_s28 = scalar_select %p1101_p11, 1, 0 }
  0x1b   : > { %p685_p12 = pneg %p1101_p11 }
  0x1c   : > { %s830_s7 = scalar_lea.hbm %s1335_s1, 256 }
  0x1d   : > { %p1110_p0 = pnand %p685_p12, %p1077_p1  ;;  %p831_p2 = scmp.ne.s32.totalorder %s1335_s1, %s830_s7 }
  0x1e   : > { %p837_p8 = scmp.lt.u32.totalorder %s830_s7, %s1335_s1 }
  0x1f   : > { %p832_p3 = pneg %p1110_p0 }
  0x21   : > { %p833_p5 = pnand %p832_p3, %p831_p2 }
  0x23   : > { %p834_p7 = pneg %p833_p5 }
  0x25   : > { %p839_p9 = pnand %p837_p8, %p834_p7 }
  0x27   : > { %842 = shalt.err (!%p839_p9)
}
  0x28   : > { %s843_s12 = scalar_lea.vmem %s138_s30, 256  ;;  %p851_p6 = scmp.lt.s32.totalorder %s138_s30, %s138_s30 }
  0x29   : > { %p844_p12 = scmp.ne.s32.totalorder %s138_s30, %s843_s12  ;;  %p852_p4 = scmp.lt.s32.totalorder %s843_s12, %s843_s12 }
  0x2b   : > { %p846_p13 = pnand %p844_p12, %p832_p3  ;;  %p853_p1 = por %p852_p4, %p851_p6 }
  0x2d   : > { %p847_p10 = pneg %p846_p13 }
  0x2f   : > { %p854_p11 = pnand %p853_p1, %p847_p10 }
  0x31   : > { %857 = shalt.err (!%p854_p11)
}
  0x32   : > { %s1321_s13 = smov 128   ;;  %s1322_s17 = smov 8  }
  0x33   : > { %688 = dma.hbm_to_vmem [thread:$0]  (!%p1110_p0), %s1335_s1, 256, %s138_s30, [#allocation6], %s1321_s13, %s1321_s13, %s1322_s17  }
  0x34   : > { %s33_s29 = sadd.s32 1, %s994_s0  ;;  %s63_s5 = sld [smem:[#allocation4]] }
  0x35   : > { %p35_p1 = scmp.ge.s32.totalorder %s33_s29, 2  ;;  %s72_s6 = sadd.s32 1, %s986_s19 }
  0x36   : > { %p79_p4 = scmp.ne.s32.totalorder %s986_s19, %s982_s18  ;;  %p80_p6 = scmp.eq.s32.totalorder %s998_s21, 0 }
  0x37   : > { %s1359_s29 = smov (%p35_p1, %s33_s29), 0  ;;  %s98_s7 = sadd.s32 1, %s974_s16 }
  0x38   : > { %1336 = sst [smem:[#allocation16_spill]] %s1359_s29  ;;  %p1140_p10 = por %p80_p6, %p79_p4 }
  0x39   : > { %s66_s8 = ssub.s32 %s994_s0, %s1359_s29  ;;  %p698_p11 = scmp.lt.s32.totalorder %s998_s21, 2 }
  0x3a   : > { %p96_p13 = scmp.eq.s32.totalorder %s66_s8, 0  ;;  %s151_s30 = sand.u32 1, %s986_s19  }
  0x3b   : > { %s623_s11 = sshll.u32 %s151_s30, 8  ;;  %s673_s12 = sshll.u32 %s994_s0, 6 }
  0x3c   : > { %s1150_s9 = scalar_select %p96_p13, %s974_s16, %s98_s7  }
  0x3d   : > { %s1153_s10 = scalar_select %p96_p13, %s986_s19, %s72_s6  }
  0x3e   : > { %s626_s22 = sshll.u32 %s63_s5, 7  ;;  %s155_s13 = scalar_lea.vmem [#allocation8], %s623_s11 }
  0x3f   : > { %s165_s23 = sadd.s32 %s673_s12, %s626_s22  ;;  %s168_s17 = sshll.u32 %s155_s13, 4  ;;  %s1156_s17 = int_to_ptr.vmem [resolvable:$true] %s168_s17 }
  0x40   : > { %s627_s1 = sshll.u32 %s165_s23, 6  ;;  %p1167_p0 = pnand %p698_p11, %p1140_p10 }
  0x41   : > { %s1161_s29 = scalar_lea.hbm %s1314_s2, %s627_s1  ;;  %s1171_s13 = scalar_lea.sflag [#allocation9], %s151_s30 }
  0x42   : > { %s858_s5 = scalar_lea.hbm %s1161_s29, 4096  ;;  %p860_p3 = pneg %p1167_p0 }
  0x43   : > { %p859_p2 = scmp.ne.s32.totalorder %s1161_s29, %s858_s5  ;;  %s863_s27 = scalar_lea.hbm %s1314_s2, 32768 }
  0x44   : > { %p864_p8 = scmp.lt.u32.totalorder %s1161_s29, %s1314_s2  ;;  %p865_p9 = scmp.lt.u32.totalorder %s863_s27, %s858_s5 }
  0x45   : > { %p861_p5 = pnand %p860_p3, %p859_p2  ;;  %p867_p1 = scmp.lt.u32.totalorder %s858_s5, %s1161_s29 }
  0x46   : > { %p866_p12 = por %p865_p9, %p864_p8 }
  0x47   : > { %p862_p7 = pneg %p861_p5 }
  0x48   : > { %p868_p4 = por %p867_p1, %p866_p12 }
  0x4a   : > { %p869_p6 = pnand %p868_p4, %p862_p7 }
  0x4c   : > { %872 = shalt.err (!%p869_p6)
}
  0x4d   : > { %s873_s8 = scalar_lea.vmem %s1156_s17, 4096  ;;  %s1003_s30 = smov [#allocation8]  }
  0x4e   : > { %p874_p10 = scmp.ne.s32.totalorder %s1156_s17, %s873_s8  ;;  %s878_s11 = sshll.u32 %s1003_s30, 4  ;;  %s879_s11 = int_to_ptr.vmem [resolvable:$false] %s878_s11 }
  0x4f   : > { %s880_s12 = scalar_lea.vmem %s879_s11, 8192  ;;  %p881_p2 = scmp.lt.s32.totalorder %s1156_s17, %s879_s11 }
  0x50   : > { %p876_p11 = pnand %p874_p10, %p860_p3  ;;  %p882_p5 = scmp.lt.s32.totalorder %s880_s12, %s873_s8 }
  0x52   : > { %p877_p13 = pneg %p876_p11  ;;  %p883_p8 = por %p882_p5, %p881_p2 }
  0x54   : > { %p884_p9 = pnand %p883_p8, %p877_p13 }
  0x56   : > { %887 = shalt.err (!%p884_p9)
}
  0x57   : > { %s1339_s22 = smov 8   ;;  %s1340_s23 = smov 128  }
  0x58   : > { %692 = dma.hbm_to_vmem [thread:$0]  (!%p1167_p0), %s1161_s29, 4096, %s1156_s17, %s1171_s13, %s1340_s23, %s1340_s23, %s1339_s22  }
  0x59   : > { %p1341_p3 = scmp.ne.s32.totalorder %s1333_s28, 0 }
  0x5a   : > { %p1342_p7 = scmp.ne.s32.totalorder (!%p1341_p3), %s1328_s24, 0 }
  0x5b   : > { %180 = sbr.rel (%p1341_p3) target bundleno = 465 (0x1d1), region = 28 }
  0x62   : > { %953 = dma.done.wait (%p1342_p7), [#allocation6], 256  }
  0x63   : > { %955 = vsyncadd (%p1342_p7), [#allocation6], 4294967040  ;;  %s186_s5 = sand.u32 1, %s982_s18   ;;  %p1343_p12 = scmp.ne.s32.totalorder %s1329_s25, 0 }
  0x64   : > { %s630_s6 = sshll.u32 %s186_s5, 8  ;;  %s187_s1 = scalar_lea.sflag [#allocation9], %s186_s5 }
  0x65   : > { %s1209_s14 = scalar_lea.vmem [#allocation8], %s630_s6 }
  0x66   : > { %957 = dma.done.wait (%p1343_p12), %s187_s1, 4096  }
  0x67   : > { %959 = vsyncadd (%p1343_p12), %s187_s1, 4294963200  ;;  %v779_v0 = vld [vmem:[%s1209_s14 + $0x4] ss:$8 sps:$4 sm:$0xff]   ;;  %v781_v1 = vld [vmem:[%s1209_s14] ss:$8 sps:$4 sm:$0xff]   ;;  %s208_s24 = sand.u32 1, %s970_s15  }
  0x68   : > { %432 = vmatprep.subr.bf16.mxu0 %v779_v0  ;;  %v782_v2 = vld [vmem:[%s1209_s14 + $0x14] ss:$8 sps:$4 sm:$0xff]   ;;  %v784_v3 = vld [vmem:[%s1209_s14 + $0x10] ss:$8 sps:$4 sm:$0xff]   ;;  %v785_v4 = vld [vmem:[%s1209_s14 + $0x24] ss:$8 sps:$4 sm:$0xff]  }
  0x69   : > { %433 = vmatpush1.bf16.xpose.msra.mxu0 %v781_v1  ;;  %v787_v5 = vld [vmem:[%s1209_s14 + $0x20] ss:$8 sps:$4 sm:$0xff]   ;;  %v788_v6 = vld [vmem:[%s1209_s14 + $0x34] ss:$8 sps:$4 sm:$0xff]   ;;  %v790_v8 = vld [vmem:[%s1209_s14 + $0x30] ss:$8 sps:$4 sm:$0xff]  }
  0x6a   : > { %434 = vmatprep.subr.bf16.mxu0 %v782_v2  ;;  %v829_v7 = vld [vmem:[#allocation5 + $0x4] ss:$8 sps:$4 sm:$0xff]   ;;  %v791_v9 = vld [vmem:[%s1209_s14 + $0x44] ss:$8 sps:$4 sm:$0xff]   ;;  %v793_v10 = vld [vmem:[%s1209_s14 + $0x40] ss:$8 sps:$4 sm:$0xff]  }
  0x6b   : > { %464 = vmatprep.mubr.bf16.mxu0 %v829_v7  ;;  %v794_v11 = vld [vmem:[%s1209_s14 + $0x54] ss:$8 sps:$4 sm:$0xff]   ;;  %v796_v12 = vld [vmem:[%s1209_s14 + $0x50] ss:$8 sps:$4 sm:$0xff]   ;;  %v797_v13 = vld [vmem:[%s1209_s14 + $0x64] ss:$8 sps:$4 sm:$0xff]  }
  0x6c   : > { %v799_v14 = vld [vmem:[%s1209_s14 + $0x60] ss:$8 sps:$4 sm:$0xff]   ;;  %v800_v15 = vld [vmem:[%s1209_s14 + $0x74] ss:$8 sps:$4 sm:$0xff]   ;;  %v802_v16 = vld [vmem:[%s1209_s14 + $0x70] ss:$8 sps:$4 sm:$0xff]  }
  0x6d   : > { %v803_v17 = vld [vmem:[%s1209_s14 + $0x84] ss:$8 sps:$4 sm:$0xff]   ;;  %v805_v18 = vld [vmem:[%s1209_s14 + $0x80] ss:$8 sps:$4 sm:$0xff]   ;;  %v806_v19 = vld [vmem:[%s1209_s14 + $0x94] ss:$8 sps:$4 sm:$0xff]  }
  0x6e   : > { %v808_v20 = vld [vmem:[%s1209_s14 + $0x90] ss:$8 sps:$4 sm:$0xff]   ;;  %v809_v21 = vld [vmem:[%s1209_s14 + $0xa4] ss:$8 sps:$4 sm:$0xff]   ;;  %v811_v22 = vld [vmem:[%s1209_s14 + $0xa0] ss:$8 sps:$4 sm:$0xff]  }
  0x6f   : > { %v812_v23 = vld [vmem:[%s1209_s14 + $0xb4] ss:$8 sps:$4 sm:$0xff]   ;;  %v814_v24 = vld [vmem:[%s1209_s14 + $0xb0] ss:$8 sps:$4 sm:$0xff]   ;;  %v815_v25 = vld [vmem:[%s1209_s14 + $0xc4] ss:$8 sps:$4 sm:$0xff]  }
  0x70   : > { %v817_v26 = vld [vmem:[%s1209_s14 + $0xc0] ss:$8 sps:$4 sm:$0xff]   ;;  %v818_v27 = vld [vmem:[%s1209_s14 + $0xd4] ss:$8 sps:$4 sm:$0xff]   ;;  %v820_v28 = vld [vmem:[%s1209_s14 + $0xd0] ss:$8 sps:$4 sm:$0xff]  }
  0x71   : > { %435 = vmatpush1.bf16.xpose.msra.mxu0 %v784_v3  ;;  %v821_v29 = vld [vmem:[%s1209_s14 + $0xe4] ss:$8 sps:$4 sm:$0xff]   ;;  %v823_v30 = vld [vmem:[%s1209_s14 + $0xe0] ss:$8 sps:$4 sm:$0xff]   ;;  %v824_v31 = vld [vmem:[%s1209_s14 + $0xf4] ss:$8 sps:$4 sm:$0xff]  }
  0x72   : > { %436 = vmatprep.subr.bf16.mxu0 %v785_v4  ;;  %v826_v32 = vld [vmem:[%s1209_s14 + $0xf0] ss:$8 sps:$4 sm:$0xff]   ;;  %s631_s25 = sshll.u32 %s208_s24, 4  ;;  %s676_s29 = sshll.u32 %s990_s20, 7 }
  0x73   : > { %v827_v33 = vld [vmem:[#allocation5] ss:$8 sps:$4 sm:$0xff]   ;;  %s210_s28 = scalar_lea.vmem [#allocation10], %s631_s25  ;;  %s1254_s4 = scalar_lea.hbm %s1315_s3, %s676_s29 }
  0x74   : > { %s518_s17 = sshll.u32 %s210_s28, 4  ;;  %s1256_s7 = scalar_lea.sflag [#allocation7], %s208_s24  ;;  %s1249_s17 = int_to_ptr.vmem [resolvable:$true] %s518_s17 }
  0x75   : > { %s888_s20 = scalar_lea.vmem %s1249_s17, 256  ;;  %p1344_p1 = scmp.ne.s32.totalorder %s1330_s26, 0 }
  0x76   : > { %p889_p0 = scmp.ne.s32.totalorder %s1249_s17, %s888_s20  ;;  %s1004_s8 = smov [#allocation10]  }
  0x77   : > { %s892_s30 = sshll.u32 %s1004_s8, 4  ;;  %s893_s30 = int_to_ptr.vmem [resolvable:$false] %s892_s30 }
  0x78   : > { %p890_p4 = pnand %p889_p0, %p1344_p1  ;;  %s894_s11 = scalar_lea.vmem %s893_s30, 512 }
  0x79   : > { %437 = vmatpush1.bf16.xpose.msra.mxu0 %v787_v5  ;;  %p895_p10 = scmp.lt.s32.totalorder %s1249_s17, %s893_s30  ;;  %p896_p11 = scmp.lt.s32.totalorder %s894_s11, %s888_s20 }
  0x7a   : > { %438 = vmatprep.subr.bf16.mxu0 %v788_v6  ;;  %p891_p6 = pneg %p890_p4 }
  0x7b   : > { %p897_p13 = por %p896_p11, %p895_p10 }
  0x7d   : > { %p898_p2 = pnand %p897_p13, %p891_p6 }
  0x81   : > { %439 = vmatpush1.bf16.xpose.msra.mxu0 %v790_v8 }
  0x82   : > { %440 = vmatprep.subr.bf16.mxu0 %v791_v9 }
  0x89   : > { %441 = vmatpush1.bf16.xpose.msra.mxu0 %v793_v10 }
  0x8a   : > { %442 = vmatprep.subr.bf16.mxu0 %v794_v11 }
  0x91   : > { %443 = vmatpush1.bf16.xpose.msra.mxu0 %v796_v12 }
  0x92   : > { %444 = vmatprep.subr.bf16.mxu0 %v797_v13 }
  0x99   : > { %445 = vmatpush1.bf16.xpose.msra.mxu0 %v799_v14 }
  0x9a   : > { %446 = vmatprep.subr.bf16.mxu0 %v800_v15 }
  0xa1   : > { %447 = vmatpush1.bf16.xpose.msra.mxu0 %v802_v16 }
  0xa2   : > { %448 = vmatprep.subr.bf16.mxu0 %v803_v17 }
  0xa9   : > { %449 = vmatpush1.bf16.xpose.msra.mxu0 %v805_v18 }
  0xaa   : > { %450 = vmatprep.subr.bf16.mxu0 %v806_v19 }
  0xb1   : > { %451 = vmatpush1.bf16.xpose.msra.mxu0 %v808_v20 }
  0xb2   : > { %452 = vmatprep.subr.bf16.mxu0 %v809_v21 }
  0xb9   : > { %453 = vmatpush1.bf16.xpose.msra.mxu0 %v811_v22 }
  0xba   : > { %454 = vmatprep.subr.bf16.mxu0 %v812_v23 }
  0xc1   : > { %455 = vmatpush1.bf16.xpose.msra.mxu0 %v814_v24 }
  0xc2   : > { %456 = vmatprep.subr.bf16.mxu0 %v815_v25 }
  0xc9   : > { %457 = vmatpush1.bf16.xpose.msra.mxu0 %v817_v26 }
  0xca   : > { %458 = vmatprep.subr.bf16.mxu0 %v818_v27 }
  0xd1   : > { %459 = vmatpush1.bf16.xpose.msra.mxu0 %v820_v28 }
  0xd2   : > { %460 = vmatprep.subr.bf16.mxu0 %v821_v29 }
  0xd9   : > { %461 = vmatpush1.bf16.xpose.msra.mxu0 %v823_v30 }
  0xda   : > { %462 = vmatprep.subr.bf16.mxu0 %v824_v31 }
  0xe1   : > { %463 = vmatpush1.bf16.xpose.msra.mxu0 %v826_v32 }
  0xe8   : > { %465 = vmatmul.mubr.bf16.vlgmr.msra.gmra.mrb[0].mxu0 %v827_v33 }
 0x1bb   : > { %v466_v34 = vpop.f32.mrb[0].mxu0 }
 0x1bc   : > { %v468_v35 = vpop.f32.mrb[1].mxu0 }
 0x1bd   : > { %v674_v36 = vpack.c.bf16 %v468_v35, %v466_v34  ;;  %v470_v37 = vpop.f32.mrb[2].mxu0 }
 0x1be   : > { %v472_v38 = vpop.f32.mrb[3].mxu0 }
 0x1bf   : > { %502 = vst [vmem:[%s210_s28] sm:$0xff] %v674_v36  ;;  %v675_v39 = vpack.c.bf16 %v472_v38, %v470_v37 }
 0x1c1   : > { %503 = vst [vmem:[%s210_s28 + $0x8] sm:$0xff] %v675_v39 }
 0x1c2   : > { %901 = shalt.err (!%p898_p2)
}
 0x1c3   : > { %s902_s12 = scalar_lea.hbm %s1254_s4, 256  ;;  %s906_s5 = scalar_lea.hbm %s1315_s3, 512 }
 0x1c4   : > { %p903_p5 = scmp.ne.s32.totalorder %s1254_s4, %s902_s12  ;;  %p907_p3 = scmp.lt.u32.totalorder %s1254_s4, %s1315_s3 }
 0x1c5   : > { %p908_p7 = scmp.lt.u32.totalorder %s906_s5, %s902_s12  ;;  %p910_p0 = scmp.lt.u32.totalorder %s902_s12, %s1254_s4 }
 0x1c6   : > { %p904_p8 = pnand %p903_p5, %p1344_p1 }
 0x1c7   : > { %p909_p12 = por %p908_p7, %p907_p3 }
 0x1c8   : > { %p905_p9 = pneg %p904_p8 }
 0x1c9   : > { %p911_p4 = por %p910_p0, %p909_p12 }
 0x1cb   : > { %p912_p6 = pnand %p911_p4, %p905_p9 }
 0x1cd   : > { %915 = shalt.err (!%p912_p6)
}
 0x1ce   : > { %s1005_s14 = smov 128   ;;  %s1006_s24 = smov 256  }
 0x1cf   : > { %s1007_s25 = smov 8  }
 0x1d0   : > { %683 = dma.vmem_to_hbm [thread:$0]  (%p1344_p1), %s1249_s17, 256, %s1254_s4, %s1256_s7, %s1005_s14, %s1006_s24, %s1007_s25  }
 0x1d1 PF: > { %s1345_s28 = sld [smem:[#allocation14_spill]]  ;;  %s1346_s29 = sld [smem:[#allocation15_spill]] }
 0x1d2   : > { %p1348_p11 = scmp.ge.s32.totalorder %s998_s21, 2 }
 0x1d7   : > { %s533_s13 = sand.u32 1, %s1345_s28   ;;  %p1347_p10 = scmp.ne.s32.totalorder %s1346_s29, 0 }
 0x1d8   : > { %s534_s27 = scalar_lea.sflag [#allocation7], %s533_s13 }
 0x1d9   : > { %p694_p13 = pnand %p1348_p11, %p1347_p10 }
 0x1db   : > { %961 = dma.done.wait (!%p694_p13), %s534_s27, 256  }
 0x1dc   : > { %963 = vsyncadd (!%p694_p13), %s534_s27, 4294967040  ;;  %s21_s21 = sadd.s32 1, %s998_s21   ;;  %s1349_s26 = sld [smem:[#allocation16_spill]] }
 0x1dd   : > { %p18_p2 = scmp.ge.s32.totalorder %s21_s21, 4   ;;  %s1350_s14 = smov %s970_s15 }
 0x1de   : > { %s1351_s15 = smov %s974_s16  ;;  %s1352_s16 = smov %s1150_s9 }
 0x1df   : > { %s1353_s17 = smov %s982_s18  ;;  %s1354_s18 = smov %s986_s19 }
 0x1e0   : > { %s1355_s19 = smov %s1153_s10  ;;  %s1356_s20 = smov %s994_s0 }
 0x1e1   :  { %20 = sbr.rel (!%p18_p2) target bundleno = 12 (0xc), region = 87 }
 0x1e2   : > { %s1357_s0 = smov %s1349_s26 }
 0x1e8   :  { %539 = vsyncpa [#allocation6], 1 }
 0x1e9   :  { %541 = vsyncpa [#allocation6 + $0x1], 1 }
 0x1ea   :  { %542 = vsyncpa [#allocation9], 1 }
 0x1eb   :  { %544 = vsyncpa [#allocation9 + $0x1], 1 }
 0x1ec   :  { %545 = vsyncpa [#allocation7], 1 }
 0x1ed   :  { %547 = vsyncpa [#allocation7 + $0x1], 1 }

</bundles_post_ra>
